<compile_context>
chip_gen: v7x
topology: tpu7x:2x2x1
jax: 0.10.0
libtpu: 0.0.40
codegen_flags: <defaults>
</compile_context>

<pallas_src>
import functools
import math

import jax
import jax.numpy as jnp
from jax.experimental import pallas as pl
from jax.experimental.pallas import tpu as pltpu


def _attn_kernel(q_ref, k_ref, v_ref, ctx_ref, attn_ref, *, scale):
    # q_ref: (tq, d_k); k_ref: (Lk, d_k); v_ref: (Lk, 2*d_v)  (V_A | V_B fused)
    # Fold the 1/sqrt(d_k) scale into the small Q tile (tq*d_k multiplies
    # instead of tq*Lk) and keep MXU operands in their native dtype.
    q = q_ref[...] * scale
    s = jax.lax.dot_general(
        q, k_ref[...], (((1,), (1,)), ((), ())),
        preferred_element_type=jnp.float32)

    # Numerically-stable softmax over the key axis, in f32.
    m = jnp.max(s, axis=-1, keepdims=True)
    p = jnp.exp(s - m)
    denom = jnp.sum(p, axis=-1, keepdims=True)
    inv = pl.reciprocal(denom)            # exact; (tq, 1) then broadcast mul
    attn = p * inv

    attn_ref[...] = attn.astype(attn_ref.dtype)

    # Single fused PV matmul -> lane-dense (tq, 2*d_v) context store.
    attn_lp = attn.astype(v_ref.dtype)
    ctx_ref[...] = jnp.dot(attn_lp, v_ref[...],
                           preferred_element_type=jnp.float32).astype(ctx_ref.dtype)


def _pick_q_tile(len_q, len_k, d_k, d_v2, itemsize, bh, *,
                 max_tile=512, vmem_budget=48 * 1024 * 1024):
    """Pick (q_tile, padded_len_q).

    The tile is the largest sublane-aligned size whose double-buffered
    footprint (Q/context/attn tiles + whole-head K/V blocks) fits a budget
    that is safe on every TPU generation (v7x has only 64 MiB of VMEM).
    """
    align = 16 if itemsize == 2 else 8    # bf16 needs (16, 128) min tiles

    def footprint(t):
        return 2 * itemsize * (t * (d_k + d_v2 + len_k) + len_k * (d_k + d_v2))

    # If batch*heads alone cannot feed both v7x TensorCores, split Lq instead.
    want_split = bh < 2 and len_q >= 2 * align

    if len_q <= max_tile and footprint(len_q) <= vmem_budget and not want_split:
        return len_q, len_q               # block == full dim: always layout-legal

    upper = max_tile
    if want_split:
        upper = min(upper, max(align, ((len_q + 1) // 2 // align) * align))
    t = min(upper, max(align, (len_q // align) * align))
    t = max(align, (t // align) * align)
    while t > align and footprint(t) > vmem_budget:
        t -= align
    # TODO(synk): if footprint(align) still exceeds the budget (very long
    # len_k), an inner key-tiled two-pass softmax over Lk blocks is needed;
    # attn is a required output, so a pure flash/online rewrite cannot apply.
    len_q_pad = -(-len_q // t) * t
    return t, len_q_pad


def abi_sdp_attention(Q, K, V_A, V_B, *, max_q_tile=512):
    """Q,K: [B,H,Lq/Lk,d_k]; V_A,V_B: [B,H,Lk,d_v] -> (context_a, context_b, attn)."""
    B, H, Lq, dk = Q.shape
    Bk, Hk, Lk, dk2 = K.shape
    dv = V_A.shape[-1]
    assert (B, H, dk) == (Bk, Hk, dk2)
    assert V_A.shape == (B, H, Lk, dv) and V_B.shape == (B, H, Lk, dv)

    BH = B * H
    dv2 = 2 * dv
    dtype = Q.dtype
    itemsize = jnp.dtype(dtype).itemsize
    scale = 1.0 / math.sqrt(dk)

    # Fuse V_A / V_B along the feature axis: one PV matmul, one lane-dense
    # context store; split back outside the kernel.
    v3 = jnp.concatenate([V_A, V_B], axis=-1).reshape(BH, Lk, dv2)
    q3 = Q.reshape(BH, Lq, dk)
    k3 = K.reshape(BH, Lk, dk)

    tq, Lq_pad = _pick_q_tile(Lq, Lk, dk, dv2, itemsize, BH, max_tile=max_q_tile)
    if Lq_pad != Lq:
        q3 = jnp.pad(q3, ((0, 0), (0, Lq_pad - Lq), (0, 0)))

    grid = (BH, Lq_pad // tq)

    # Explicit scoped-VMEM limit from the real footprint (defaults are only
    # 16/32 MiB); kept well under v7x's 64 MiB physical VMEM.
    fp = 2 * itemsize * (tq * (dk + dv2 + Lk) + Lk * (dk + dv2))
    vmem_limit = int(min(60 * 2**20, max(32 * 2**20, fp + (8 << 20))))

    flops = BH * (2 * Lq_pad * Lk * dk + 2 * Lq_pad * Lk * dv2)
    transcendentals = BH * Lq_pad * Lk
    bytes_accessed = itemsize * BH * (
        Lq_pad * dk + Lk * dk + Lk * dv2 + Lq_pad * dv2 + Lq_pad * Lk)

    ctx3, attn3 = pl.pallas_call(
        functools.partial(_attn_kernel, scale=scale),
        out_shape=(
            jax.ShapeDtypeStruct((BH, Lq_pad, dv2), dtype),   # fused contexts
            jax.ShapeDtypeStruct((BH, Lq_pad, Lk), dtype),    # attn
        ),
        grid_spec=pltpu.PrefetchScalarGridSpec(
            num_scalar_prefetch=0,
            grid=grid,
            in_specs=[
                pl.BlockSpec((None, tq, dk), lambda b, i: (b, i, 0)),    # Q tile
                pl.BlockSpec((None, Lk, dk), lambda b, i: (b, 0, 0)),    # K (whole head)
                pl.BlockSpec((None, Lk, dv2), lambda b, i: (b, 0, 0)),   # V_A|V_B fused
            ],
            out_specs=[
                pl.BlockSpec((None, tq, dv2), lambda b, i: (b, i, 0)),   # fused context
                pl.BlockSpec((None, tq, Lk), lambda b, i: (b, i, 0)),    # attn
            ],
        ),
        compiler_params=pltpu.CompilerParams(
            dimension_semantics=("parallel", "parallel"),
            vmem_limit_bytes=vmem_limit),
        cost_estimate=pl.CostEstimate(
            flops=flops, transcendentals=transcendentals,
            bytes_accessed=bytes_accessed),
    )(q3, k3, v3)

    ctx = ctx3[:, :Lq, :].reshape(B, H, Lq, dv2)
    context_a = ctx[..., :dv]
    context_b = ctx[..., dv:]
    attn = attn3[:, :Lq, :].reshape(B, H, Lq, Lk)
    return context_a, context_b, attn


if __name__ == "__main__":
    key = jax.random.PRNGKey(0)
    kq, kk, kva, kvb = jax.random.split(key, 4)

    batch, n_heads, len_q, len_k, d_k, d_v = 2, 4, 8, 8, 32, 32
    Q = jax.random.normal(kq, (batch, n_heads, len_q, d_k), jnp.float32)
    K = jax.random.normal(kk, (batch, n_heads, len_k, d_k), jnp.float32)
    V_A = jax.random.normal(kva, (batch, n_heads, len_k, d_v), jnp.float32)
    V_B = jax.random.normal(kvb, (batch, n_heads, len_k, d_v), jnp.float32)

    ca, cb, attn = abi_sdp_attention(Q, K, V_A, V_B)
    jax.block_until_ready((ca, cb, attn))

    # Pure-JAX reference
    scale = 1.0 / math.sqrt(d_k)
    scores = jnp.einsum("bhqd,bhkd->bhqk", Q, K) * scale
    attn_ref = jax.nn.softmax(scores, axis=-1)
    ca_ref = jnp.einsum("bhqk,bhkv->bhqv", attn_ref, V_A)
    cb_ref = jnp.einsum("bhqk,bhkv->bhqv", attn_ref, V_B)

    assert jnp.allclose(attn, attn_ref, atol=1e-5, rtol=1e-5)
    assert jnp.allclose(ca, ca_ref, atol=1e-5, rtol=1e-5)
    assert jnp.allclose(cb, cb_ref, atol=1e-5, rtol=1e-5)

    print("KERNEL_OK")
</pallas_src>

<mosaic_0001>
module attributes {stable_mosaic.version = 11 : i64} {
  func.func @_attn_kernel(%arg0: i32, %arg1: i32, %arg2: memref<1x8x32xf32, #tpu.memory_space<vmem>>, %arg3: memref<1x8x32xf32, #tpu.memory_space<vmem>>, %arg4: memref<1x8x64xf32, #tpu.memory_space<vmem>>, %arg5: memref<1x8x64xf32, #tpu.memory_space<vmem>>, %arg6: memref<1x8x8xf32, #tpu.memory_space<vmem>>) attributes {dimension_semantics = [#tpu.dimension_semantics<parallel>, #tpu.dimension_semantics<parallel>], iteration_bounds = array<i64: 8, 1>, scalar_prefetch = 0 : i64, scratch_operands = 0 : i64, tpu.core_type = #tpu.core_type<tc>, window_params = [{transform_indices = @transform_0, window_bounds = array<i64: 1, 8, 32>}, {transform_indices = @transform_1, window_bounds = array<i64: 1, 8, 32>}, {transform_indices = @transform_2, window_bounds = array<i64: 1, 8, 64>}, {transform_indices = @transform_3, window_bounds = array<i64: 1, 8, 64>}, {transform_indices = @transform_4, window_bounds = array<i64: 1, 8, 8>}]} {
    %c0 = arith.constant 0 : index
    %c0_0 = arith.constant 0 : index
    %c0_1 = arith.constant 0 : index
    %0 = vector.load %arg2[%c0, %c0_0, %c0_1] : memref<1x8x32xf32, #tpu.memory_space<vmem>>, vector<1x8x32xf32>
    %1 = vector.shape_cast %0 : vector<1x8x32xf32> to vector<8x32xf32>
    %cst = arith.constant 0.176776692 : f32
    %2 = vector.broadcast %cst : f32 to vector<8x32xf32>
    %3 = arith.mulf %1, %2 : vector<8x32xf32>
    %c0_2 = arith.constant 0 : index
    %c0_3 = arith.constant 0 : index
    %c0_4 = arith.constant 0 : index
    %4 = vector.load %arg3[%c0_2, %c0_3, %c0_4] : memref<1x8x32xf32, #tpu.memory_space<vmem>>, vector<1x8x32xf32>
    %5 = vector.shape_cast %4 : vector<1x8x32xf32> to vector<8x32xf32>
    %cst_5 = arith.constant dense<0.000000e+00> : vector<8x8xf32>
    %6 = tpu.matmul %3, %5, %cst_5 {dimension_numbers = #tpu.dot_dimension_numbers<[1], [1], [0], [0], [0, 0, 1, 0], [], []>} : vector<8x32xf32>, vector<8x32xf32>, vector<8x8xf32> -> vector<8x8xf32>
    %cst_6 = arith.constant dense<0xFF800000> : vector<8xf32>
    %7 = vector.multi_reduction <maximumf>, %6, %cst_6 [1] : vector<8x8xf32> to vector<8xf32>
    %8 = vector.shape_cast %7 : vector<8xf32> to vector<8x1xf32>
    %9 = vector.broadcast %8 : vector<8x1xf32> to vector<8x8xf32>
    %10 = arith.subf %6, %9 : vector<8x8xf32>
    %11 = math.exp %10 : vector<8x8xf32>
    %cst_7 = arith.constant dense<0.000000e+00> : vector<8xf32>
    %12 = vector.multi_reduction <add>, %11, %cst_7 [1] : vector<8x8xf32> to vector<8xf32>
    %13 = vector.shape_cast %12 : vector<8xf32> to vector<8x1xf32>
    %14 = tpu.reciprocal %13 : vector<8x1xf32> -> vector<8x1xf32>
    %15 = vector.broadcast %14 : vector<8x1xf32> to vector<8x8xf32>
    %16 = arith.mulf %11, %15 : vector<8x8xf32>
    %c0_8 = arith.constant 0 : index
    %c0_9 = arith.constant 0 : index
    %c0_10 = arith.constant 0 : index
    %17 = vector.load %arg6[%c0_8, %c0_9, %c0_10] : memref<1x8x8xf32, #tpu.memory_space<vmem>>, vector<1x8x8xf32>
    %18 = vector.shape_cast %17 : vector<1x8x8xf32> to vector<8x8xf32>
    %19 = vector.shape_cast %16 : vector<8x8xf32> to vector<1x8x8xf32>
    tpu.vector_store %arg6[%c0_8, %c0_9, %c0_10], %19 {strides = array<i32>} : memref<1x8x8xf32, #tpu.memory_space<vmem>>, vector<1x8x8xf32>,
    %c0_11 = arith.constant 0 : index
    %c0_12 = arith.constant 0 : index
    %c0_13 = arith.constant 0 : index
    %20 = vector.load %arg4[%c0_11, %c0_12, %c0_13] : memref<1x8x64xf32, #tpu.memory_space<vmem>>, vector<1x8x64xf32>
    %21 = vector.shape_cast %20 : vector<1x8x64xf32> to vector<8x64xf32>
    %cst_14 = arith.constant dense<0.000000e+00> : vector<8x64xf32>
    %22 = tpu.matmul %16, %21, %cst_14 {dimension_numbers = #tpu.dot_dimension_numbers<[1], [0], [0], [1], [0, 0, 1, 1], [], []>} : vector<8x8xf32>, vector<8x64xf32>, vector<8x64xf32> -> vector<8x64xf32>
    %c0_15 = arith.constant 0 : index
    %c0_16 = arith.constant 0 : index
    %c0_17 = arith.constant 0 : index
    %23 = vector.load %arg5[%c0_15, %c0_16, %c0_17] : memref<1x8x64xf32, #tpu.memory_space<vmem>>, vector<1x8x64xf32>
    %24 = vector.shape_cast %23 : vector<1x8x64xf32> to vector<8x64xf32>
    %25 = vector.shape_cast %22 : vector<8x64xf32> to vector<1x8x64xf32>
    tpu.vector_store %arg5[%c0_15, %c0_16, %c0_17], %25 {strides = array<i32>} : memref<1x8x64xf32, #tpu.memory_space<vmem>>, vector<1x8x64xf32>,
    return
  }
  func.func @transform_0(%arg0: i32, %arg1: i32) -> (i32, i32, i32) {
    %c0_i32 = arith.constant 0 : i32
    %c0_i32_0 = arith.constant 0 : i32
    return %arg0, %arg1, %c0_i32 : i32, i32, i32
  }
  func.func @transform_1(%arg0: i32, %arg1: i32) -> (i32, i32, i32) {
    %c0_i32 = arith.constant 0 : i32
    %c0_i32_0 = arith.constant 0 : i32
    %c0_i32_1 = arith.constant 0 : i32
    return %arg0, %c0_i32, %c0_i32_0 : i32, i32, i32
  }
  func.func @transform_2(%arg0: i32, %arg1: i32) -> (i32, i32, i32) {
    %c0_i32 = arith.constant 0 : i32
    %c0_i32_0 = arith.constant 0 : i32
    %c0_i32_1 = arith.constant 0 : i32
    return %arg0, %c0_i32, %c0_i32_0 : i32, i32, i32
  }
  func.func @transform_3(%arg0: i32, %arg1: i32) -> (i32, i32, i32) {
    %c0_i32 = arith.constant 0 : i32
    %c0_i32_0 = arith.constant 0 : i32
    return %arg0, %arg1, %c0_i32 : i32, i32, i32
  }
  func.func @transform_4(%arg0: i32, %arg1: i32) -> (i32, i32, i32) {
    %c0_i32 = arith.constant 0 : i32
    %c0_i32_0 = arith.constant 0 : i32
    return %arg0, %arg1, %c0_i32 : i32, i32, i32
  }
}

</mosaic_0001>

<bundles_post_ra>
// kernel: tpu_custom_call.1
= control target key start
LH: loop header
LB: loop body
LE: loop exit
PB: predicated region body
PF: predicated region fallthrough
CT: control target
= control target key end

     0   :  { %s1331_s0 = inlined_call_operand.hbm [shape: f32[8,8,32], index: 0, kind: input, shape index: {}]   ;;  %s1332_s1 = inlined_call_operand.hbm [shape: f32[8,8,32], index: 1, kind: input, shape index: {}]   ;;  %s1333_s2 = inlined_call_operand.hbm [shape: f32[8,8,64], index: 2, kind: input, shape index: {}]   ;;  %s1334_s3 = inlined_call_operand.hbm [shape: f32[8,8,64], index: 3, kind: output, shape index: {0}]   ;;  %s1335_s4 = inlined_call_operand.hbm [shape: f32[8,8,8], index: 4, kind: output, shape index: {1}]  }
   0x1   :  { %1343 = sst [smem:[#allocation19_spill]] %s1332_s1 }
   0x2   :  { %10 = vsyncpa [#allocation3], 0 }
   0x3   :  { %12 = vsyncpa [#allocation3 + $0x1], 0 }
   0x4   :  { %13 = vsyncpa [#allocation6], 0 }
   0x5   :  { %15 = vsyncpa [#allocation6 + $0x1], 0 }
   0x6   :  { %16 = vsyncpa [#allocation4], 0 }
   0x7   :  { %18 = vsyncpa [#allocation4 + $0x1], 0 }
   0x8   :  { %19 = vsyncpa [#allocation10], 0 }
   0x9   :  { %21 = vsyncpa [#allocation10 + $0x1], 0  ;;  %s1037_s15 = smov 0   ;;  %s1039_s16 = smov 0  }
   0xa   :  { %s1041_s17 = smov 0   ;;  %s1043_s18 = smov 0  }
   0xb   :  { %s1045_s19 = smov 0   ;;  %s1047_s20 = smov 0  }
   0xc LB: > { %1344 = sst [smem:[#allocation15_spill]] %s999_s19  ;;  %s1068_s21 = sadd.s32 4294967295, %s1003_s20   ;;  %s1003_s20 = sphi %s1047_s20, %s27_s20   ;;  %s999_s19 = sphi %s1045_s19, %s1367_s19   ;;  %s995_s18 = sphi %s1043_s18, %s1366_s18   ;;  %s991_s17 = sphi %s1041_s17, %s1370_s17   ;;  %s987_s16 = sphi %s1039_s16, %s1369_s16   ;;  %s983_s15 = sphi %s1037_s15, %s1368_s15  }
   0xd   : > { %s674_s22 = sadd.s32 4294967294, %s1003_s20   ;;  %s39_s23 = sadd.s32 1, %s999_s19 }
   0xe   : > { %s48_s24 = sadd.s32 1, %s991_s17  ;;  %p41_p0 = scmp.ge.s32.totalorder %s39_s23, 8 }
   0xf   : > { %p55_p1 = scmp.ne.s32.totalorder %s991_s17, %s987_s16  ;;  %p56_p2 = scmp.eq.s32.totalorder %s1003_s20, 0 }
  0x10   : > { %p61_p3 = scmp.ne.s32.totalorder %s987_s16, %s983_s15  ;;  %s1372_s23 = smov (%p41_p0, %s39_s23), 0 }
  0x11   : > { %1345 = sst [smem:[#allocation16_spill]] %s1372_s23  ;;  %p1080_p4 = por %p56_p2, %p55_p1 }
  0x12   : > { %p62_p5 = scmp.eq.s32.totalorder %s1068_s21, 0  ;;  %s43_s26 = ssub.s32 %s999_s19, %s1372_s23 }
  0x13   : > { %p139_p6 = scmp.eq.s32.totalorder %s1068_s21, 7  ;;  %p46_p7 = scmp.eq.s32.totalorder %s43_s26, 0 }
  0x14   : > { %p1088_p8 = por %p62_p5, %p61_p3  ;;  %p145_p10 = scmp.eq.s32.totalorder %s674_s22, 7 }
  0x15   : > { %p1092_p9 = por %p139_p6, %p55_p1  ;;  %p739_p12 = scmp.lt.s32.totalorder %s1003_s20, 8 }
  0x16   : > { %s1347_s27 = scalar_select %p1088_p8, 1, 0 }
  0x17   : > { %s1348_s28 = scalar_select %p1092_p9, 1, 0 }
  0x18   : > { %s1097_s29 = scalar_select %p46_p7, %s991_s17, %s48_s24  }
  0x19   : > { %p1099_p11 = por %p145_p10, %p61_p3  ;;  %s1336_s5 = sand.u32 1, %s991_s17  }
  0x1a   : > { %1349 = sst [smem:[#allocation17_spill]] %s1097_s29  ;;  %s1107_s6 = sshll.u32 %s1336_s5, 3 }
  0x1b   : > { %s1350_s30 = scalar_select %p1099_p11, 1, 0 }
  0x1c   : > { %s1110_s7 = sshll.u32 %s999_s19, 7  ;;  %p1114_p13 = pnand %p739_p12, %p1080_p4 }
  0x1d   : > { %1351 = sst [smem:[#allocation18_spill]] %s1350_s30  ;;  %s212_s9 = sand.u32 1, %s1003_s20  }
  0x1e   : > { %s1352_s8 = scalar_select %p1114_p13, 1, 0 }
  0x1f   : > { %s1353_s1 = sld [smem:[#allocation19_spill]]  ;;  %s216_s13 = scalar_lea.vmem [#allocation5], %s1107_s6 }
  0x20   : > { %s223_s14 = sshll.u32 %s216_s13, 4  ;;  %s1130_s22 = scalar_lea.sflag [#allocation6], %s212_s9  ;;  %s1127_s14 = int_to_ptr.vmem [resolvable:$true] %s223_s14 }
  0x21   : > { %p1136_p3 = pneg %p1114_p13 }
  0x25   : > { %s1123_s12 = scalar_lea.hbm %s1353_s1, %s1110_s7  ;;  %s800_s11 = scalar_lea.hbm %s1353_s1, 1024 }
  0x26   : > { %s795_s24 = scalar_lea.hbm %s1123_s12, 128  ;;  %p801_p6 = scmp.lt.u32.totalorder %s1123_s12, %s1353_s1 }
  0x27   : > { %p796_p2 = scmp.ne.s32.totalorder %s1123_s12, %s795_s24  ;;  %p802_p7 = scmp.lt.u32.totalorder %s800_s11, %s795_s24 }
  0x28   : > { %p804_p12 = scmp.lt.u32.totalorder %s795_s24, %s1123_s12 }
  0x29   : > { %p798_p4 = pnand %p1136_p3, %p796_p2  ;;  %p803_p10 = por %p802_p7, %p801_p6 }
  0x2b   : > { %p799_p5 = pneg %p798_p4  ;;  %p805_p0 = por %p804_p12, %p803_p10 }
  0x2d   : > { %p806_p1 = pnand %p805_p0, %p799_p5 }
  0x2f   : > { %809 = shalt.err (!%p806_p1)
}
  0x30   : > { %s810_s9 = scalar_lea.vmem %s1127_s14, 128  ;;  %s1005_s26 = smov [#allocation5]  }
  0x31   : > { %p811_p2 = scmp.ne.s32.totalorder %s1127_s14, %s810_s9  ;;  %s815_s10 = sshll.u32 %s1005_s26, 4  ;;  %s816_s10 = int_to_ptr.vmem [resolvable:$false] %s815_s10 }
  0x32   : > { %s817_s5 = scalar_lea.vmem %s816_s10, 256  ;;  %p818_p9 = scmp.lt.s32.totalorder %s1127_s14, %s816_s10 }
  0x33   : > { %p813_p4 = pnand %p811_p2, %p1136_p3  ;;  %p819_p8 = scmp.lt.s32.totalorder %s817_s5, %s810_s9 }
  0x35   : > { %p814_p11 = pneg %p813_p4  ;;  %p820_p6 = por %p819_p8, %p818_p9 }
  0x37   : > { %p821_p7 = pnand %p820_p6, %p814_p11 }
  0x39   : > { %824 = shalt.err (!%p821_p7)
}
  0x3a   : > { %728 = dma.hbm_to_vmem [thread:$0]  (!%p1114_p13), %s1123_s12, 128, %s1127_s14, %s1130_s22  }
  0x3b   : > { %p1355_p0 = scmp.lt.s32.totalorder %s1003_s20, 9  ;;  %p1356_p1 = scmp.ge.s32.totalorder %s1003_s20, 1 }
  0x3c   : > { %s1172_s9 = scalar_lea.hbm %s1331_s0, %s1110_s7  ;;  %s197_s26 = scalar_lea.vmem [#allocation2], %s1107_s6 }
  0x3d   : > { %p1164_p5 = pnand %p1356_p1, %p1355_p0  ;;  %s205_s10 = sshll.u32 %s197_s26, 4  ;;  %s1175_s10 = int_to_ptr.vmem [resolvable:$true] %s205_s10 }
  0x3e   : > { %s1181_s5 = scalar_lea.hbm %s1333_s2, %s1110_s7  ;;  %s1358_s1 = sand.u32 1, %s991_s17  }
  0x3f   : > { %s1357_s24 = scalar_select %p1164_p5, 1, 0 }
  0x40   : > { %s194_s23 = scalar_lea.sflag [#allocation3], %s1358_s1  ;;  %s825_s19 = scalar_lea.hbm %s1172_s9, 128 }
  0x41   : > { %p826_p8 = scmp.ne.s32.totalorder %s1172_s9, %s825_s19  ;;  %s830_s29 = scalar_lea.hbm %s1331_s0, 1024 }
  0x42   : > { %p831_p10 = scmp.lt.u32.totalorder %s1172_s9, %s1331_s0  ;;  %p832_p12 = scmp.lt.u32.totalorder %s830_s29, %s825_s19 }
  0x43   : > { %p828_p9 = pnand %p826_p8, %p1136_p3  ;;  %p834_p4 = scmp.lt.u32.totalorder %s825_s19, %s1172_s9 }
  0x44   : > { %p833_p2 = por %p832_p12, %p831_p10 }
  0x45   : > { %p829_p11 = pneg %p828_p9 }
  0x46   : > { %p835_p6 = por %p834_p4, %p833_p2 }
  0x48   : > { %p836_p7 = pnand %p835_p6, %p829_p11 }
  0x4a   : > { %839 = shalt.err (!%p836_p7)
}
  0x4b   : > { %s840_s1 = scalar_lea.vmem %s1175_s10, 128  ;;  %s1006_s7 = smov [#allocation2]  }
  0x4c   : > { %p841_p0 = scmp.ne.s32.totalorder %s1175_s10, %s840_s1  ;;  %s845_s12 = sshll.u32 %s1006_s7, 4  ;;  %s846_s12 = int_to_ptr.vmem [resolvable:$false] %s845_s12 }
  0x4d   : > { %s847_s30 = scalar_lea.vmem %s846_s12, 256  ;;  %p848_p9 = scmp.lt.s32.totalorder %s1175_s10, %s846_s12 }
  0x4e   : > { %p843_p1 = pnand %p841_p0, %p1136_p3  ;;  %p849_p5 = scmp.lt.s32.totalorder %s847_s30, %s840_s1 }
  0x50   : > { %p844_p8 = pneg %p843_p1  ;;  %p850_p10 = por %p849_p5, %p848_p9 }
  0x52   : > { %p851_p12 = pnand %p850_p10, %p844_p8 }
  0x54   : > { %854 = shalt.err (!%p851_p12)
}
  0x55   : > { %725 = dma.hbm_to_vmem [thread:$0]  (!%p1114_p13), %s1172_s9, 128, %s1175_s10, %s194_s23  }
  0x56   : > { %s234_s19 = scalar_lea.vmem [#allocation7], %s1107_s6  ;;  %s855_s14 = scalar_lea.hbm %s1181_s5, 128 }
  0x57   : > { %s241_s29 = sshll.u32 %s234_s19, 4  ;;  %p856_p11 = scmp.ne.s32.totalorder %s1181_s5, %s855_s14  ;;  %s242_s29 = int_to_ptr.vmem [resolvable:$true] %s241_s29 }
  0x58   : > { %s860_s26 = scalar_lea.hbm %s1333_s2, 1024  ;;  %p861_p4 = scmp.lt.u32.totalorder %s1181_s5, %s1333_s2 }
  0x59   : > { %p858_p5 = pnand %p856_p11, %p1136_p3  ;;  %p862_p6 = scmp.lt.u32.totalorder %s860_s26, %s855_s14 }
  0x5a   : > { %p864_p0 = scmp.lt.u32.totalorder %s855_s14, %s1181_s5 }
  0x5b   : > { %p859_p2 = pneg %p858_p5  ;;  %p863_p7 = por %p862_p6, %p861_p4 }
  0x5d   : > { %p865_p1 = por %p864_p0, %p863_p7 }
  0x5f   : > { %p866_p8 = pnand %p865_p1, %p859_p2 }
  0x61   : > { %869 = shalt.err (!%p866_p8)
}
  0x62   : > { %s870_s23 = scalar_lea.vmem %s242_s29, 128  ;;  %s1007_s6 = smov [#allocation7]  }
  0x63   : > { %p871_p9 = scmp.ne.s32.totalorder %s242_s29, %s870_s23  ;;  %s875_s9 = sshll.u32 %s1007_s6, 4  ;;  %s876_s9 = int_to_ptr.vmem [resolvable:$false] %s875_s9 }
  0x64   : > { %s877_s10 = scalar_lea.vmem %s876_s9, 256  ;;  %p878_p11 = scmp.lt.s32.totalorder %s242_s29, %s876_s9 }
  0x65   : > { %p873_p10 = pnand %p871_p9, %p1136_p3  ;;  %p879_p5 = scmp.lt.s32.totalorder %s877_s10, %s870_s23 }
  0x67   : > { %p874_p12 = pneg %p873_p10  ;;  %p880_p13 = por %p879_p5, %p878_p11 }
  0x69   : > { %p881_p4 = pnand %p880_p13, %p874_p12 }
  0x6b   : > { %884 = shalt.err (!%p881_p4)
}
  0x6c   : > { %p1359_p6 = scmp.ne.s32.totalorder %s1352_s8, 0  ;;  %p1360_p2 = scmp.ne.s32.totalorder %s1357_s24, 0 }
  0x6d   : > { %s1228_s25 = sand.u32 (!%p1360_p2), 1, %s987_s16   ;;  %p1361_p13 = scmp.ne.s32.totalorder (!%p1360_p2), %s1347_s27, 0 }
  0x6e   : > { %731 = dma.hbm_to_vmem [thread:$0]  (!%p1359_p6), %s1181_s5, 128, %s242_s29, %s1130_s22  }
  0x6f   : > { %250 = sbr.rel (%p1360_p2) target bundleno = 880 (0x370), region = 32  ;;  %s1231_s12 = sshll.u32 (!%p1360_p2), %s1228_s25, 3 }
  0x70   : > { %s253_s30 = scalar_lea.sflag (!%p1360_p2), [#allocation3], %s1228_s25  ;;  %s256_s19 = scalar_lea.vmem (!%p1360_p2), [#allocation2], %s1231_s12 }
  0x76   : > { %966 = dma.done.wait (%p1361_p13), %s253_s30, 128  }
  0x77   : > { %968 = vsyncadd (%p1361_p13), %s253_s30, 4294967168  ;;  %s261_s8 = sand.u32 1, %s1068_s21   ;;  %s265_s24 = scalar_lea.vmem [#allocation5], %s1231_s12 }
  0x78   : > { %s262_s22 = scalar_lea.sflag [#allocation6], %s261_s8 }
  0x79   : > { %970 = dma.done.wait (%p1361_p13), %s262_s22, 256  }
  0x7a   : > { %972 = vsyncadd (%p1361_p13), %s262_s22, 4294967040  ;;  %v1008_v0 = vmov 0.0   ;;  %vm1009_vm0 = vmmov 0   ;;  %vm317_vm1 = vcmask 261120   ;;  %v316_v1 = vld [vmem:[%s265_s24] sm:$0xff]  ;;  %v314_v2 = vld [vmem:[%s256_s19] sm:$0xff] }
  0x7b   : > { %702 = vmatprep.subr.mxu0 %v1008_v0  ;;  %704 = vmatprep.mubr.msk.f32.mxu0 %vm1009_vm0, %v1008_v0  ;;  %v315_v3 = vmul.f32 0.17677669, %v314_v2  ;;  %vm394_vm2 = vcmask 64512   ;;  %s274_s21 = scalar_lea.vmem [#allocation7], %s1231_s12  ;;  %s313_s27 = scalar_lea.vmem [#allocation9], %s1231_s12 }
  0x7c   : > { %707 = vmatprep.subr.mxu1 %v1008_v0  ;;  %709 = vmatprep.mubr.msk.f32.mxu1 %vm1009_vm0, %v1008_v0  ;;  %v407_v12 = vld [vmem:[%s274_s21] sm:$0xff]  ;;  %s694_s5 = sshll.u32 %s995_s18, 7  ;;  %s517_s13 = sshll.u32 %s313_s27, 4  ;;  %s518_s13 = int_to_ptr.vmem [resolvable:$true] %s517_s13 }
  0x7d   : > { %703 = vmatpush3.xpose.msk.msra.mxu0 %vm317_vm1, %v316_v1  ;;  %708 = vmatpush3.msra.mxu1 %v407_v12  ;;  %s1257_s11 = scalar_lea.hbm %s1335_s4, %s694_s5  ;;  %s489_s26 = scalar_lea.sflag [#allocation10], %s1228_s25 }
  0x7e   : > { %s885_s1 = scalar_lea.vmem %s518_s13, 128  ;;  %p1362_p7 = scmp.ne.s32.totalorder %s1348_s28, 0 }
  0x7f   : > { %p886_p3 = scmp.ne.s32.totalorder %s518_s13, %s885_s1  ;;  %s1010_s7 = smov [#allocation9]  }
  0x80   : > { %705 = vmatmul.mubr.msk.f32.vlgmr.msra.gmra.mrb[0].mxu0 %vm317_vm1, %v315_v3  ;;  %s889_s23 = sshll.u32 %s1010_s7, 4  ;;  %s890_s23 = int_to_ptr.vmem [resolvable:$false] %s889_s23 }
  0x81   : > { %p887_p0 = pnand %p886_p3, %p1362_p7  ;;  %s891_s6 = scalar_lea.vmem %s890_s23, 256 }
  0x82   : > { %p892_p8 = scmp.lt.s32.totalorder %s518_s13, %s890_s23  ;;  %p893_p9 = scmp.lt.s32.totalorder %s891_s6, %s885_s1 }
  0x83   : > { %p888_p1 = pneg %p887_p0 }
  0x84   : > { %p894_p10 = por %p893_p9, %p892_p8 }
  0x86   : > { %p895_p12 = pnand %p894_p10, %p888_p1 }
 0x153   : > { %v390_v4 = vpop.f32.mrb[0].mxu0 }
 0x154   : > { %v706_v5 = vpop.f32.mrb[1].mxu0  ;;  %v395_v6 = vsel %vm394_vm2, %v390_v4, -inf }
 0x155   : > { %396 = vmax.xlane.f32.xlu0 %v395_v6 }
 0x1e2   : > { %v397_v7 = vpop.xlane.xlu0 %396 }
 0x1e3   : > { %v398_v8 = vsub.f32 %v390_v4, %v397_v7 }
 0x1e5   : > { %v399_v9 = vmul.f32 1.442695, %v398_v8 }
 0x1e7   : > { %791 = vpow2.f32 %v399_v9 }
 0x1f1   : > { %v792_v10 = vpop.eup %791 }
 0x1f2   : > { %v401_v11 = vsel %vm394_vm2, %v792_v10, 0.0 }
 0x1f3   : > { %402 = vadd.xlane.f32.xlu0 %v401_v11 }
 0x280   : > { %v403_v13 = vpop.xlane.xlu0 %402 }
 0x281   : > { %793 = vrcp.f32 %v403_v13 }
 0x28b   : > { %v794_v14 = vpop.eup %793 }
 0x28c   : > { %v405_v15 = vmul.f32 %v794_v14, %v792_v10 }
 0x28e   : > { %710 = vmatmul.mubr.msk.f32.vlgmr.msra.gmra.mrb[0].mxu1 %vm394_vm2, %v405_v15  ;;  %406 = vst.msk [vmem:[%s313_s27] sm:$0xff] %vm394_vm2, %v405_v15 }
 0x28f   : > { %898 = shalt.err (!%p895_p12)
}
 0x290   : > { %s899_s9 = scalar_lea.hbm %s1257_s11, 128  ;;  %s903_s19 = scalar_lea.hbm %s1335_s4, 1024 }
 0x291   : > { %p900_p11 = scmp.ne.s32.totalorder %s1257_s11, %s899_s9  ;;  %p904_p6 = scmp.lt.u32.totalorder %s1257_s11, %s1335_s4 }
 0x292   : > { %p905_p2 = scmp.lt.u32.totalorder %s903_s19, %s899_s9  ;;  %p907_p3 = scmp.lt.u32.totalorder %s899_s9, %s1257_s11 }
 0x293   : > { %p901_p5 = pnand %p900_p11, %p1362_p7 }
 0x294   : > { %p906_p13 = por %p905_p2, %p904_p6 }
 0x295   : > { %p902_p4 = pneg %p901_p5 }
 0x296   : > { %p908_p0 = por %p907_p3, %p906_p13 }
 0x298   : > { %p909_p1 = pnand %p908_p0, %p902_p4 }
 0x29a   : > { %912 = shalt.err (!%p909_p1)
}
 0x29b   : > { %719 = dma.vmem_to_hbm [thread:$0]  (%p1362_p7), %s518_s13, 128, %s1257_s11, %s489_s26   ;;  %vm481_vm3 = vcmask 523264  }
 0x29c   : > { %s306_s24 = scalar_lea.vmem [#allocation8], %s1231_s12  ;;  %s1283_s14 = scalar_lea.hbm %s1334_s3, %s694_s5 }
 0x29d   : > { %s503_s21 = sshll.u32 %s306_s24, 4  ;;  %s484_s1 = scalar_lea.sflag [#allocation4], %s1228_s25  ;;  %s1285_s21 = int_to_ptr.vmem [resolvable:$true] %s503_s21 }
 0x29e   : > { %s913_s7 = scalar_lea.vmem %s1285_s21, 128  ;;  %s1011_s18 = smov [#allocation8]  }
 0x29f   : > { %p914_p8 = scmp.ne.s32.totalorder %s1285_s21, %s913_s7  ;;  %s917_s12 = sshll.u32 %s1011_s18, 4  ;;  %s918_s12 = int_to_ptr.vmem [resolvable:$false] %s917_s12 }
 0x2a0   : > { %s919_s11 = scalar_lea.vmem %s918_s12, 256  ;;  %p920_p12 = scmp.lt.s32.totalorder %s1285_s21, %s918_s12 }
 0x2a1   : > { %p915_p9 = pnand %p914_p8, %p1362_p7  ;;  %p921_p11 = scmp.lt.s32.totalorder %s919_s11, %s913_s7 }
 0x2a3   : > { %p916_p10 = pneg %p915_p9  ;;  %p922_p5 = por %p921_p11, %p920_p12 }
 0x2a5   : > { %p923_p4 = pnand %p922_p5, %p916_p10 }
 0x361   : > { %v477_v16 = vpop.f32.mrb[0].mxu1 }
 0x362   : > { %482 = vst.msk [vmem:[%s306_s24] sm:$0xff] %vm481_vm3, %v477_v16  ;;  %v711_v17 = vpop.f32.mrb[1].mxu1 }
 0x363   : > { %926 = shalt.err (!%p923_p4)
}
 0x364   : > { %s927_s25 = scalar_lea.hbm %s1283_s14, 128  ;;  %s931_s26 = scalar_lea.hbm %s1334_s3, 1024 }
 0x365   : > { %p928_p6 = scmp.ne.s32.totalorder %s1283_s14, %s927_s25  ;;  %p932_p3 = scmp.lt.u32.totalorder %s1283_s14, %s1334_s3 }
 0x366   : > { %p933_p0 = scmp.lt.u32.totalorder %s931_s26, %s927_s25  ;;  %p935_p8 = scmp.lt.u32.totalorder %s927_s25, %s1283_s14 }
 0x367   : > { %p929_p2 = pnand %p928_p6, %p1362_p7 }
 0x368   : > { %p934_p1 = por %p933_p0, %p932_p3 }
 0x369   : > { %p930_p13 = pneg %p929_p2 }
 0x36a   : > { %p936_p9 = por %p935_p8, %p934_p1 }
 0x36c   : > { %p937_p10 = pnand %p936_p9, %p930_p13 }
 0x36e   : > { %940 = shalt.err (!%p937_p10)
}
 0x36f   : > { %718 = dma.vmem_to_hbm [thread:$0]  (%p1362_p7), %s1285_s21, 128, %s1283_s14, %s484_s1  }
 0x370 PF: > { %s1363_s9 = sld [smem:[#allocation18_spill]]  ;;  %p740_p12 = scmp.ge.s32.totalorder %s1003_s20, 2 }
 0x371   : > { %s529_s10 = sand.u32 1, %s983_s15  }
 0x372   : > { %s530_s30 = scalar_lea.sflag [#allocation4], %s529_s10 }
 0x376   : > { %p1364_p11 = scmp.ne.s32.totalorder %s1363_s9, 0 }
 0x378   : > { %p733_p5 = pnand %p740_p12, %p1364_p11 }
 0x37a   : > { %974 = dma.done.wait (!%p733_p5), %s530_s30, 128  }
 0x37b   : > { %976 = vsyncadd (!%p733_p5), %s530_s30, 4294967168  ;;  %s539_s19 = scalar_lea.sflag [#allocation10], %s529_s10 }
 0x37c   : > { %978 = dma.done.wait (!%p733_p5), %s539_s19, 128  }
 0x37d   : > { %980 = vsyncadd (!%p733_p5), %s539_s19, 4294967168  ;;  %s27_s20 = sadd.s32 1, %s1003_s20   ;;  %s1365_s28 = sld [smem:[#allocation17_spill]] }
 0x37e   : > { %p24_p4 = scmp.ge.s32.totalorder %s27_s20, 10   ;;  %s1366_s18 = sld [smem:[#allocation15_spill]] }
 0x37f   : > { %s1367_s19 = sld [smem:[#allocation16_spill]]  ;;  %s1368_s15 = smov %s987_s16 }
 0x380   : > { %s1369_s16 = smov %s991_s17  ;;  %26 = sbr.rel (!%p24_p4) target bundleno = 12 (0xc), region = 118 }
 0x383   : > { %s1370_s17 = smov %s1365_s28 }
 0x387   :  { %544 = vsyncpa [#allocation3], 1 }
 0x388   :  { %546 = vsyncpa [#allocation3 + $0x1], 1 }
 0x389   :  { %547 = vsyncpa [#allocation6], 1 }
 0x38a   :  { %549 = vsyncpa [#allocation6 + $0x1], 1 }
 0x38b   :  { %550 = vsyncpa [#allocation4], 1 }
 0x38c   :  { %552 = vsyncpa [#allocation4 + $0x1], 1 }
 0x38d   :  { %553 = vsyncpa [#allocation10], 1 }
 0x38e   :  { %555 = vsyncpa [#allocation10 + $0x1], 1 }

</bundles_post_ra>
